<compile_context>
chip_gen: v7x
topology: tpu7x:2x2x1
jax: 0.10.0
libtpu: 0.0.40
codegen_flags: <defaults>
</compile_context>

<pallas_src>
import functools

import jax
import jax.numpy as jnp
from jax.experimental import pallas as pl
from jax.experimental.pallas import tpu as pltpu


def _round_up(v, m):
    return ((v + m - 1) // m) * m


def _swiglu_kernel(x_ref, wg_ref, wu_ref, wd_ref, o_ref, acc_ref):
    """One (row_tile, hidden_tile) step of fused SwiGLU.

    x_ref  : (br, F)      input rows (resident across the hidden axis)
    wg_ref : (F, bh)      gate weight tile (pre-transposed)
    wu_ref : (F, bh)      up   weight tile (pre-transposed)
    wd_ref : (bh, F)      down weight tile (pre-transposed)
    o_ref  : (br, F)      output rows (written on the last hidden tile)
    acc_ref: (br, F) f32  down-projection accumulator (scratch)
    """
    h = pl.program_id(1)

    @pl.when(h == 0)
    def _init():
        acc_ref[...] = jnp.zeros_like(acc_ref)

    x = x_ref[...]
    # gate / up projections for this hidden slice (MXU, f32 accumulate)
    g = jnp.dot(x, wg_ref[...], preferred_element_type=jnp.float32)
    u = jnp.dot(x, wu_ref[...], preferred_element_type=jnp.float32)
    # SiLU(gate) * up computed in f32 (sigmoid goes to the EUP slot)
    act = (g * jax.nn.sigmoid(g)) * u
    # partial down projection, accumulated across hidden tiles
    acc_ref[...] += jnp.dot(act.astype(wd_ref.dtype), wd_ref[...],
                            preferred_element_type=jnp.float32)

    @pl.when(h == pl.num_programs(1) - 1)
    def _finalize():
        o_ref[...] = acc_ref[...].astype(o_ref.dtype)


def swiglu(x, gate_w, up_w, down_w, *, block_rows=256, block_hidden=512):
    """SwiGLU forward matching the PyTorch module (useconv=False, bias=False).

    gate_w, up_w: (4*features, features)   (nn.Linear weight layout)
    down_w:       (features, 4*features)
    """
    features = x.shape[-1]
    hidden = gate_w.shape[0]               # 4 * features
    lead = x.shape[:-1]
    rows = 1
    for d in lead:
        rows *= d

    out_dtype = jnp.promote_types(x.dtype, down_w.dtype)
    w_dtype = gate_w.dtype

    # One-time wrapper-side transposes so the kernel only does row-major dots.
    wg_t = gate_w.T                         # (F, H)
    wu_t = up_w.T                           # (F, H)
    wd_t = down_w.T                         # (H, F)

    # ---- tile sizing -------------------------------------------------------
    # Sublane packing: 8 rows (f32), 16 (bf16), 32 (8-bit).
    sub = 8 * max(1, 4 // jnp.dtype(x.dtype).itemsize)
    br = min(block_rows, _round_up(rows, sub))
    br = _round_up(br, sub)
    rows_p = _round_up(rows, br)            # cdiv + zero-pad instead of whole-slab fallback

    # Hidden (reduction) tiles are lane-dense multiples of 128.
    hidden_p = _round_up(hidden, 128)
    bh = _round_up(min(block_hidden, hidden_p), 128)
    hidden_p = _round_up(hidden_p, bh)

    # ---- zero padding (padded rows / hidden columns contribute exactly 0) ---
    x2d = x.reshape(rows, features)
    if rows_p != rows:
        x2d = jnp.pad(x2d, ((0, rows_p - rows), (0, 0)))
    if hidden_p != hidden:
        dh = hidden_p - hidden
        wg_t = jnp.pad(wg_t, ((0, 0), (0, dh)))
        wu_t = jnp.pad(wu_t, ((0, 0), (0, dh)))
        wd_t = jnp.pad(wd_t, ((0, dh), (0, 0)))

    grid = (rows_p // br, hidden_p // bh)

    # ---- VMEM budget (double-buffered tiles + f32 temporaries) --------------
    itm_x = jnp.dtype(x.dtype).itemsize
    itm_w = jnp.dtype(w_dtype).itemsize
    itm_o = jnp.dtype(out_dtype).itemsize
    est = (2 * br * features * itm_x            # x tile (x2 bufs)
           + 2 * 2 * features * bh * itm_w      # gate + up weight tiles
           + 2 * bh * features * itm_w          # down weight tile
           + 2 * br * features * itm_o          # output tile
           + br * features * 4                  # f32 accumulator scratch
           + 3 * br * bh * 4)                   # f32 g / u / act temporaries
    vmem_limit = int(min(48 * 1024 * 1024, max(16 * 1024 * 1024, 2 * est)))

    cost = pl.CostEstimate(
        flops=6 * rows * features * hidden,     # 3 matmuls of 2*M*K*N
        transcendentals=rows * hidden,          # one sigmoid per gate element
        bytes_accessed=(rows * features * (itm_x + itm_o)
                        + 3 * features * hidden * itm_w),
    )

    out = pl.pallas_call(
        _swiglu_kernel,
        out_shape=jax.ShapeDtypeStruct((rows_p, features), out_dtype),
        grid_spec=pltpu.PrefetchScalarGridSpec(
            num_scalar_prefetch=0,
            grid=grid,
            in_specs=[
                pl.BlockSpec((br, features), lambda i, h: (i, 0)),   # x rows
                pl.BlockSpec((features, bh), lambda i, h: (0, h)),   # gate W^T
                pl.BlockSpec((features, bh), lambda i, h: (0, h)),   # up   W^T
                pl.BlockSpec((bh, features), lambda i, h: (h, 0)),   # down W^T
            ],
            out_specs=pl.BlockSpec((br, features), lambda i, h: (i, 0)),
            scratch_shapes=[pltpu.VMEM((br, features), jnp.float32)],
        ),
        compiler_params=pltpu.CompilerParams(
            # rows are independent (megacore-shardable); hidden is the reduction
            dimension_semantics=("parallel", "arbitrary"),
            vmem_limit_bytes=vmem_limit,
        ),
        cost_estimate=cost,
    )(x2d, wg_t, wu_t, wd_t)

    if rows_p != rows:
        out = out[:rows]
    return out.reshape(lead + (features,))


# TODO(synk): the optional useconv=True branch (depthwise 3x3 Conv2d between the
# gate/up product and the down projection) is not implemented; the module's
# default configuration (useconv=False -> nn.Identity) is what this kernel covers.


if __name__ == "__main__":
    # Shapes implied by the module forward: x is (batch, seq, features).
    batch, seq, features = 2, 8, 32
    hidden = 4 * features

    key = jax.random.PRNGKey(0)
    kx, kg, ku, kd = jax.random.split(key, 4)
    scale = 1.0 / (features ** 0.5)
    x = jax.random.normal(kx, (batch, seq, features), dtype=jnp.float32)
    gate_w = jax.random.normal(kg, (hidden, features), dtype=jnp.float32) * scale
    up_w = jax.random.normal(ku, (hidden, features), dtype=jnp.float32) * scale
    down_w = jax.random.normal(kd, (features, hidden), dtype=jnp.float32) * scale

    out = swiglu(x, gate_w, up_w, down_w)
    out = jax.block_until_ready(out)

    # Pure-JAX reference (same math as the PyTorch forward with useconv=False).
    g = x @ gate_w.T
    u = x @ up_w.T
    ref = (jax.nn.silu(g) * u) @ down_w.T

    assert out.shape == ref.shape
    assert jnp.allclose(out, ref, atol=2e-2, rtol=2e-2), float(
        jnp.max(jnp.abs(out - ref)))

    print("KERNEL_OK")
</pallas_src>

<mosaic_0001>
module attributes {stable_mosaic.version = 11 : i64} {
  func.func @_swiglu_kernel(%arg0: i32, %arg1: i32, %arg2: memref<16x32xf32, #tpu.memory_space<vmem>>, %arg3: memref<32x128xf32, #tpu.memory_space<vmem>>, %arg4: memref<32x128xf32, #tpu.memory_space<vmem>>, %arg5: memref<128x32xf32, #tpu.memory_space<vmem>>, %arg6: memref<16x32xf32, #tpu.memory_space<vmem>>, %arg7: memref<16x32xf32, #tpu.memory_space<vmem>>) attributes {dimension_semantics = [#tpu.dimension_semantics<parallel>, #tpu.dimension_semantics<arbitrary>], iteration_bounds = array<i64: 1, 1>, scalar_prefetch = 0 : i64, scratch_operands = 1 : i64, tpu.core_type = #tpu.core_type<tc>, window_params = [{transform_indices = @transform_0, window_bounds = array<i64: 16, 32>}, {transform_indices = @transform_1, window_bounds = array<i64: 32, 128>}, {transform_indices = @transform_2, window_bounds = array<i64: 32, 128>}, {transform_indices = @transform_3, window_bounds = array<i64: 128, 32>}, {transform_indices = @transform_4, window_bounds = array<i64: 16, 32>}]} {
    %c0_i32 = arith.constant 0 : i32
    %0 = arith.cmpi eq, %arg1, %c0_i32 : i32
    %1 = arith.extui %0 : i1 to i32
    %c0_i32_0 = arith.constant 0 : i32
    %2 = arith.cmpi ne, %1, %c0_i32_0 : i32
    scf.if %2 {
      %cst_17 = arith.constant 0.000000e+00 : f32
      %23 = vector.broadcast %cst_17 : f32 to vector<16x32xf32>
      %c0_18 = arith.constant 0 : index
      %c0_19 = arith.constant 0 : index
      %24 = vector.load %arg7[%c0_18, %c0_19] : memref<16x32xf32, #tpu.memory_space<vmem>>, vector<16x32xf32>
      tpu.vector_store %arg7[%c0_18, %c0_19], %23 {strides = array<i32>} : memref<16x32xf32, #tpu.memory_space<vmem>>, vector<16x32xf32>,
    } else {
    }
    %c0 = arith.constant 0 : index
    %c0_1 = arith.constant 0 : index
    %3 = vector.load %arg2[%c0, %c0_1] : memref<16x32xf32, #tpu.memory_space<vmem>>, vector<16x32xf32>
    %c0_2 = arith.constant 0 : index
    %c0_3 = arith.constant 0 : index
    %4 = vector.load %arg3[%c0_2, %c0_3] : memref<32x128xf32, #tpu.memory_space<vmem>>, vector<32x128xf32>
    %cst = arith.constant dense<0.000000e+00> : vector<16x128xf32>
    %5 = tpu.matmul %3, %4, %cst {dimension_numbers = #tpu.dot_dimension_numbers<[1], [0], [0], [1], [0, 0, 1, 1], [], []>} : vector<16x32xf32>, vector<32x128xf32>, vector<16x128xf32> -> vector<16x128xf32>
    %c0_4 = arith.constant 0 : index
    %c0_5 = arith.constant 0 : index
    %6 = vector.load %arg4[%c0_4, %c0_5] : memref<32x128xf32, #tpu.memory_space<vmem>>, vector<32x128xf32>
    %cst_6 = arith.constant dense<0.000000e+00> : vector<16x128xf32>
    %7 = tpu.matmul %3, %6, %cst_6 {dimension_numbers = #tpu.dot_dimension_numbers<[1], [0], [0], [1], [0, 0, 1, 1], [], []>} : vector<16x32xf32>, vector<32x128xf32>, vector<16x128xf32> -> vector<16x128xf32>
    %8 = arith.negf %5 : vector<16x128xf32>
    %9 = math.exp %8 : vector<16x128xf32>
    %cst_7 = arith.constant 1.000000e+00 : f32
    %10 = vector.broadcast %cst_7 : f32 to vector<16x128xf32>
    %11 = arith.addf %10, %9 : vector<16x128xf32>
    %12 = arith.divf %10, %11 : vector<16x128xf32>
    %13 = arith.mulf %5, %12 : vector<16x128xf32>
    %14 = arith.mulf %13, %7 : vector<16x128xf32>
    %c0_8 = arith.constant 0 : index
    %c0_9 = arith.constant 0 : index
    %15 = vector.load %arg7[%c0_8, %c0_9] : memref<16x32xf32, #tpu.memory_space<vmem>>, vector<16x32xf32>
    %c0_10 = arith.constant 0 : index
    %c0_11 = arith.constant 0 : index
    %16 = vector.load %arg5[%c0_10, %c0_11] : memref<128x32xf32, #tpu.memory_space<vmem>>, vector<128x32xf32>
    %cst_12 = arith.constant dense<0.000000e+00> : vector<16x32xf32>
    %17 = tpu.matmul %14, %16, %cst_12 {dimension_numbers = #tpu.dot_dimension_numbers<[1], [0], [0], [1], [0, 0, 1, 1], [], []>} : vector<16x128xf32>, vector<128x32xf32>, vector<16x32xf32> -> vector<16x32xf32>
    %18 = arith.addf %15, %17 : vector<16x32xf32>
    %c0_13 = arith.constant 0 : index
    %c0_14 = arith.constant 0 : index
    %19 = vector.load %arg7[%c0_13, %c0_14] : memref<16x32xf32, #tpu.memory_space<vmem>>, vector<16x32xf32>
    tpu.vector_store %arg7[%c0_13, %c0_14], %18 {strides = array<i32>} : memref<16x32xf32, #tpu.memory_space<vmem>>, vector<16x32xf32>,
    %c0_i32_15 = arith.constant 0 : i32
    %20 = arith.cmpi eq, %arg1, %c0_i32_15 : i32
    %21 = arith.extui %20 : i1 to i32
    %c0_i32_16 = arith.constant 0 : i32
    %22 = arith.cmpi ne, %21, %c0_i32_16 : i32
    scf.if %22 {
      %c0_17 = arith.constant 0 : index
      %c0_18 = arith.constant 0 : index
      %23 = vector.load %arg7[%c0_17, %c0_18] : memref<16x32xf32, #tpu.memory_space<vmem>>, vector<16x32xf32>
      %c0_19 = arith.constant 0 : index
      %c0_20 = arith.constant 0 : index
      %24 = vector.load %arg6[%c0_19, %c0_20] : memref<16x32xf32, #tpu.memory_space<vmem>>, vector<16x32xf32>
      tpu.vector_store %arg6[%c0_19, %c0_20], %23 {strides = array<i32>} : memref<16x32xf32, #tpu.memory_space<vmem>>, vector<16x32xf32>,
    } else {
    }
    return
  }
  func.func @transform_0(%arg0: i32, %arg1: i32) -> (i32, i32) {
    %c0_i32 = arith.constant 0 : i32
    %c0_i32_0 = arith.constant 0 : i32
    return %arg0, %c0_i32 : i32, i32
  }
  func.func @transform_1(%arg0: i32, %arg1: i32) -> (i32, i32) {
    %c0_i32 = arith.constant 0 : i32
    %c0_i32_0 = arith.constant 0 : i32
    return %c0_i32, %arg1 : i32, i32
  }
  func.func @transform_2(%arg0: i32, %arg1: i32) -> (i32, i32) {
    %c0_i32 = arith.constant 0 : i32
    %c0_i32_0 = arith.constant 0 : i32
    return %c0_i32, %arg1 : i32, i32
  }
  func.func @transform_3(%arg0: i32, %arg1: i32) -> (i32, i32) {
    %c0_i32 = arith.constant 0 : i32
    %c0_i32_0 = arith.constant 0 : i32
    return %arg1, %c0_i32 : i32, i32
  }
  func.func @transform_4(%arg0: i32, %arg1: i32) -> (i32, i32) {
    %c0_i32 = arith.constant 0 : i32
    %c0_i32_0 = arith.constant 0 : i32
    return %arg0, %c0_i32 : i32, i32
  }
}

</mosaic_0001>

<bundles_post_ra>
// kernel: tpu_custom_call.1
= control target key start
LH: loop header
LB: loop body
LE: loop exit
PB: predicated region body
PF: predicated region fallthrough
CT: control target
= control target key end

     0   :  { %vm22_vm0 = vcmask 261120   ;;  %s634_s0 = inlined_call_operand.vmem [shape: f32[16,32], index: 0, kind: input, shape index: {}]   ;;  %s635_s1 = inlined_call_operand.vmem [shape: f32[32,128], index: 1, kind: input, shape index: {}]   ;;  %s636_s2 = inlined_call_operand.vmem [shape: f32[32,128], index: 2, kind: input, shape index: {}]   ;;  %s637_s3 = inlined_call_operand.vmem [shape: f32[128,32], index: 3, kind: input, shape index: {}]   ;;  %s638_s4 = inlined_call_operand.hbm [shape: f32[16,32], index: 4, kind: output, shape index: {}]  }
   0x1   :  { %v27_v0 = vld [vmem:[%s635_s1] sm:$0xff]  ;;  %v28_v1 = vld [vmem:[%s635_s1 + $0x8] sm:$0xff]  ;;  %v29_v2 = vld [vmem:[%s635_s1 + $0x10] sm:$0xff] }
   0x2   :  { %v421_v3 = vpack.c.bf16 %v28_v1, %v27_v0  ;;  %v30_v4 = vld [vmem:[%s635_s1 + $0x18] sm:$0xff]  ;;  %v25_v5 = vld [vmem:[%s634_s0] sm:$0xff]  ;;  %v114_v8 = vld [vmem:[%s636_s2 + $0x8] sm:$0xff] }
   0x3   :  { %v425_v6 = vpack.c.bf16 %v30_v4, %v29_v2  ;;  %372 = vmatprep.mubr.msk.f32.mxu1 %vm22_vm0, %v25_v5  ;;  %v113_v7 = vld [vmem:[%s636_s2] sm:$0xff] }
   0x4   :  { %422 = vmatprep.subr.bf16.mxu1 %v421_v3 }
   0x5   :  { %9 = vsyncpa [#allocation4], 0  ;;  %424 = vmatpush3.bf16.msra.mxu1 %v421_v3  ;;  %v429_v9 = vpack.c.bf16 %v114_v8, %v113_v7  ;;  %v115_v10 = vld [vmem:[%s636_s2 + $0x10] sm:$0xff]  ;;  %v116_v11 = vld [vmem:[%s636_s2 + $0x18] sm:$0xff]  ;;  %v505_v38 = vmov 0.0  }
   0x6   :  { %426 = vmatprep.subr.bf16.mxu1 %v425_v6  ;;  %v26_v12 = vld [vmem:[%s634_s0 + $0x8] sm:$0xff]  ;;  %v433_v13 = vpack.c.bf16 %v116_v11, %v115_v10  ;;  %v210_v14 = vld [vmem:[%s637_s3] sm:$0xff]  ;;  %v212_v17 = vld [vmem:[%s637_s3 + $0x10] sm:$0xff]  ;;  %24 = vst.msk [vmem:[#allocation2 + $0x8] sm:$0xff] %vm22_vm0, %v505_v38 }
   0x7   :  { %v211_v15 = vld [vmem:[%s637_s3 + $0x8] sm:$0xff]  ;;  %v213_v18 = vld [vmem:[%s637_s3 + $0x18] sm:$0xff]  ;;  %v214_v20 = vld [vmem:[%s637_s3 + $0x20] sm:$0xff]  ;;  %23 = vst.msk [vmem:[#allocation2] sm:$0xff] %vm22_vm0, %v505_v38 }
   0x8   :  { %v437_v16 = vpack.c.bf16 %v211_v15, %v210_v14  ;;  %v441_v19 = vpack.c.bf16 %v213_v18, %v212_v17  ;;  %v215_v21 = vld [vmem:[%s637_s3 + $0x28] sm:$0xff]  ;;  %v216_v23 = vld [vmem:[%s637_s3 + $0x30] sm:$0xff]  ;;  %v217_v24 = vld [vmem:[%s637_s3 + $0x38] sm:$0xff] }
   0x9   :  { %428 = vmatpush3.bf16.msra.mxu1 %v425_v6  ;;  %v445_v22 = vpack.c.bf16 %v215_v21, %v214_v20  ;;  %v449_v25 = vpack.c.bf16 %v217_v24, %v216_v23  ;;  %v218_v26 = vld [vmem:[%s637_s3 + $0x40] sm:$0xff]  ;;  %v219_v27 = vld [vmem:[%s637_s3 + $0x48] sm:$0xff]  ;;  %v220_v29 = vld [vmem:[%s637_s3 + $0x50] sm:$0xff] }
   0xa   :  { %430 = vmatprep.subr.bf16.mxu1 %v429_v9  ;;  %438 = vmatprep.subr.bf16.mxu0 %v437_v16  ;;  %v453_v28 = vpack.c.bf16 %v219_v27, %v218_v26  ;;  %v221_v30 = vld [vmem:[%s637_s3 + $0x58] sm:$0xff]  ;;  %v222_v32 = vld [vmem:[%s637_s3 + $0x60] sm:$0xff]  ;;  %v223_v33 = vld [vmem:[%s637_s3 + $0x68] sm:$0xff] }
   0xb   :  { %440 = vmatpush3.bf16.msra.mxu0 %v437_v16  ;;  %v457_v31 = vpack.c.bf16 %v221_v30, %v220_v29  ;;  %v461_v34 = vpack.c.bf16 %v223_v33, %v222_v32  ;;  %v224_v35 = vld [vmem:[%s637_s3 + $0x70] sm:$0xff]  ;;  %v225_v36 = vld [vmem:[%s637_s3 + $0x78] sm:$0xff]  ;;  %s506_s3 = smov [#allocation3]  }
   0xc   :  { %373 = vmatmul.mubr.msk.f32.vlgmr.msra.gmra.mrb[0].mxu1 %vm22_vm0, %v26_v12  ;;  %442 = vmatprep.subr.bf16.mxu0 %v441_v19  ;;  %v465_v37 = vpack.c.bf16 %v225_v36, %v224_v35  ;;  %s317_s10 = sshll.u32 %s506_s3, 4  ;;  %s318_s10 = int_to_ptr.vmem [resolvable:$true] %s317_s10 }
   0xd   :  { %432 = vmatpush3.bf16.msra.mxu1 %v429_v9  ;;  %383 = vmatprep.mubr.msk.f32.mxu1 %vm22_vm0, %v25_v5  ;;  %v209_v55 = vld [vmem:[#allocation2 + $0x8] sm:$0xff]  ;;  %s481_s0 = scalar_lea.vmem %s318_s10, 256  ;;  %p486_p1 = scmp.lt.s32.totalorder %s318_s10, %s318_s10 }
   0xe   :  { %434 = vmatprep.subr.bf16.mxu1 %v433_v13  ;;  %v208_v56 = vld [vmem:[#allocation2] sm:$0xff]  ;;  %p482_p0 = scmp.ne.s32.totalorder %s318_s10, %s481_s0  ;;  %p487_p2 = scmp.lt.s32.totalorder %s481_s0, %s481_s0 }
   0xf   :  { %444 = vmatpush3.bf16.msra.mxu0 %v441_v19 }
  0x10   :  { %446 = vmatprep.subr.bf16.mxu0 %v445_v22  ;;  %p488_p3 = por %p487_p2, %p486_p1 }
  0x11   :  { %436 = vmatpush3.bf16.msra.mxu1 %v433_v13 }
  0x12   :  { %p489_p4 = pnand %p488_p3, %p482_p0 }
  0x13   :  { %448 = vmatpush3.bf16.msra.mxu0 %v445_v22 }
  0x14   :  { %384 = vmatmul.mubr.msk.f32.vlgmr.msra.gmra.mrb[2].mxu1 %vm22_vm0, %v26_v12  ;;  %450 = vmatprep.subr.bf16.mxu0 %v449_v25 }
  0x17   :  { %452 = vmatpush3.bf16.msra.mxu0 %v449_v25 }
  0x18   :  { %454 = vmatprep.subr.bf16.mxu0 %v453_v28 }
  0x1b   :  { %456 = vmatpush3.bf16.msra.mxu0 %v453_v28 }
  0x1c   :  { %458 = vmatprep.subr.bf16.mxu0 %v457_v31 }
  0x1f   :  { %460 = vmatpush3.bf16.msra.mxu0 %v457_v31 }
  0x20   :  { %462 = vmatprep.subr.bf16.mxu0 %v461_v34 }
  0x23   :  { %464 = vmatpush3.bf16.msra.mxu0 %v461_v34 }
  0x24   :  { %466 = vmatprep.subr.bf16.mxu0 %v465_v37 }
  0x27   :  { %468 = vmatpush3.bf16.msra.mxu0 %v465_v37 }
  0xdf   :  { %v374_v39 = vpop.f32.mrb[0].mxu1 }
  0xe0   :  { %v333_v40 = vmul.f32 -1.442695, %v374_v39  ;;  %v104_v41 = vpop.f32.mrb[1].mxu1 }
  0xe1   :  { %v332_v42 = vmul.f32 -1.442695, %v104_v41 }
  0xe2   :  { %473 = vpow2.f32 %v333_v40 }
  0xe3   :  { %475 = vpow2.f32 %v332_v42 }
  0xe7   :  { %v385_v43 = vpop.f32.mrb[2].mxu1 }
  0xe8   :  { %v183_v44 = vpop.f32.mrb[3].mxu1 }
  0xec   :  { %v474_v45 = vpop.eup %473 }
  0xed   :  { %v476_v46 = vpop.eup %475  ;;  %v199_v47 = vadd.f32 1.0, %v474_v45 }
  0xee   :  { %v198_v48 = vadd.f32 1.0, %v476_v46 }
  0xef   :  { %477 = vrcp.f32 %v199_v47 }
  0xf0   :  { %479 = vrcp.f32 %v198_v48 }
  0xf9   :  { %v478_v49 = vpop.eup %477 }
  0xfa   :  { %v480_v50 = vpop.eup %479  ;;  %v205_v51 = vmul.f32 %v478_v49, %v374_v39 }
  0xfb   :  { %v204_v52 = vmul.f32 %v480_v50, %v104_v41 }
  0xfc   :  { %v207_v53 = vmul.f32 %v385_v43, %v205_v51 }
  0xfd   :  { %v206_v54 = vmul.f32 %v204_v52, %v183_v44 }
  0xff   :  { %418 = vmatprep.mubr.f32.mxu0 %v206_v54 }
 0x100   :  { %419 = vmatmul.mubr.f32.vlgmr.msra.gmra.mrb[0].mxu0 %v207_v53 }
 0x1d3   :  { %v420_v57 = vpop.f32.mrb[0].mxu0 }
 0x1d4   :  { %v302_v58 = vadd.f32 %v420_v57, %v209_v55  ;;  %v292_v59 = vpop.f32.mrb[1].mxu0 }
 0x1d5   :  { %v301_v60 = vadd.f32 %v292_v59, %v208_v56 }
 0x1d6   :  { %304 = vst.msk [vmem:[#allocation2 + $0x8] sm:$0xff] %vm22_vm0, %v302_v58 }
 0x1d7   :  { %303 = vst.msk [vmem:[#allocation2] sm:$0xff] %vm22_vm0, %v301_v60 }
 0x1dd   :  { %v309_v61 = vld [vmem:[#allocation2 + $0x8] sm:$0xff] }
 0x1de   :  { %v308_v62 = vld [vmem:[#allocation2] sm:$0xff]  ;;  %311 = vst.msk [vmem:[#allocation3 + $0x8] sm:$0xff] %vm22_vm0, %v309_v61 }
 0x1df   :  { %310 = vst.msk [vmem:[#allocation3] sm:$0xff] %vm22_vm0, %v308_v62 }
 0x1e0   :  { %492 = shalt.err (!%p489_p4)
}
 0x1e1   :  { %s493_s13 = scalar_lea.hbm %s638_s4, 256 }
 0x1e2   :  { %p494_p5 = scmp.ne.s32.totalorder %s638_s4, %s493_s13  ;;  %p497_p6 = scmp.lt.u32.totalorder %s493_s13, %s638_s4 }
 0x1e4   :  { %p499_p7 = pnand %p497_p6, %p494_p5 }
 0x1e6   :  { %502 = shalt.err (!%p499_p7)
}
 0x1e7   :  { %s507_s18 = smov 128   ;;  %s508_s19 = smov 8  }
 0x1e8   :  { %323 = dma.vmem_to_hbm [thread:$0]  %s318_s10, 256, %s638_s4, [#allocation4], %s507_s18, %s507_s18, %s508_s19  }
 0x1e9   :  { %503 = dma.done.wait [#allocation4], 256  }
 0x1ea   :  { %504 = vsyncadd [#allocation4], 4294967040 }
 0x1eb   :  { %327 = vsyncpa [#allocation4], 1 }

</bundles_post_ra>
